<compile_context>
chip_gen: v7x
topology: tpu7x:2x2x1
jax: 0.10.0
libtpu: 0.0.40
codegen_flags: <defaults>
</compile_context>

<pallas_src>
import jax
import jax.numpy as jnp
from jax.experimental import pallas as pl
from jax.experimental.pallas import tpu as pltpu


def attention_kernel(x_ref, w_ref, wp_ref, bp_ref, o_ref):
    # x_ref  : (9*Cin+1, N*HW) bf16  im2col patches + trailing ones row (bias)
    # w_ref  : (Cout+2*Cs, 9*Cin+1) bf16  BN-folded weights [v|q|k] + bias col
    # wp_ref : (Cs, 1) f32   BN-folded psi 1x1 conv weight (VMEM)
    # bp_ref : (1, 1) f32    psi bias (SMEM scalar)
    # o_ref  : (Cout, N*HW) f32
    Cout = o_ref.shape[0]
    Cs = wp_ref.shape[0]

    # One fused MXU matmul for v, q, k (+ bias via the ones row); f32 acc.
    y = jnp.dot(w_ref[...], x_ref[...], preferred_element_type=jnp.float32)
    y = jnp.maximum(y, 0.0)                                # (Cout+2*Cs, N*HW)

    # Sublane-aligned slices (Cout, Cs are multiples of 8).
    v = y[:Cout]                                           # (Cout, N*HW)
    q = y[Cout:Cout + Cs]                                  # (Cs, N*HW)
    k = y[Cout + Cs:]                                      # (Cs, N*HW)

    # psi branch: ReLU(q*k) is a no-op (q,k >= 0).  1x1 conv with a single
    # output channel = VPU multiply + sublane reduce, then ReLU + Sigmoid.
    qk = q * k
    p = jnp.sum(qk * wp_ref[...], axis=0, keepdims=True) + bp_ref[0, 0]
    psi = jax.nn.sigmoid(jnp.maximum(p, 0.0))              # (1, N*HW)

    o_ref[...] = psi * v                                   # lane-dense store


def attention_pallas(x_nchw, params):
    wq, bq, wk, bk, wv, bv, wp, bp = params
    N, Cin, H, W = x_nchw.shape
    Cs = wq.shape[1]
    Cout = wv.shape[3]
    HW = H * W
    NHW = N * HW
    K = 9 * Cin
    Ctot = Cout + 2 * Cs

    # im2col: 9 shifted views, tap-major / channel-minor rows, batch folded
    # into the lane axis -> (K, N*HW).
    xpad = jnp.pad(x_nchw, ((0, 0), (0, 0), (1, 1), (1, 1)))
    taps = [xpad[:, :, dh:dh + H, dw:dw + W]
            for dh in range(3) for dw in range(3)]          # each (N,Cin,H,W)
    xim = jnp.stack(taps, axis=0)                           # (9, N, Cin, H, W)
    xim = jnp.transpose(xim, (0, 2, 1, 3, 4)).reshape(K, NHW)
    # Ones row so the bias rides inside the matmul.
    xim = jnp.concatenate([xim, jnp.ones((1, NHW), xim.dtype)], axis=0)
    xim = xim.astype(jnp.bfloat16)                          # (K+1, N*HW)

    # Combined weight (Ctot, K+1): v uses all 9 taps; q/k only the center tap
    # (dh=1, dw=1 -> rows [4*Cin, 5*Cin)); last column holds the folded bias.
    wv_flat = wv.reshape(K, Cout)
    wq_full = jnp.zeros((K, Cs), jnp.float32).at[4 * Cin:5 * Cin].set(wq)
    wk_full = jnp.zeros((K, Cs), jnp.float32).at[4 * Cin:5 * Cin].set(wk)
    w_all = jnp.concatenate([wv_flat, wq_full, wk_full], axis=1).T  # (Ctot, K)
    b_all = jnp.concatenate(
        [bv.reshape(-1), bq.reshape(-1), bk.reshape(-1)]).reshape(Ctot, 1)
    w_ext = jnp.concatenate([w_all, b_all], axis=1).astype(jnp.bfloat16)

    out = pl.pallas_call(
        attention_kernel,
        out_shape=jax.ShapeDtypeStruct((Cout, NHW), jnp.float32),
        in_specs=[
            pl.BlockSpec(memory_space=pltpu.MemorySpace.VMEM),   # im2col
            pl.BlockSpec(memory_space=pltpu.MemorySpace.VMEM),   # weights
            pl.BlockSpec(memory_space=pltpu.MemorySpace.VMEM),   # psi weight
            pl.BlockSpec(memory_space=pltpu.MemorySpace.SMEM),   # psi bias
        ],
        out_specs=pl.BlockSpec(memory_space=pltpu.MemorySpace.VMEM),
    )(xim, w_ext, wp.reshape(Cs, 1), bp.reshape(1, 1))

    # (Cout, N*HW) -> (N, Cout, H, W): tiny wrapper-side reshape/transpose.
    return jnp.transpose(out.reshape(Cout, N, H, W), (1, 0, 2, 3))


def make_folded_conv(key, kh, kw, cin, cout, eps=1e-3):
    """Deterministic Conv2d + BatchNorm2d (eval mode) parameters, BN folded in.

    Returns HWIO weight (kh, kw, cin, cout) and bias (1, cout)."""
    k1, k2, k3, k4, k5, k6 = jax.random.split(key, 6)
    w = jax.random.normal(k1, (kh, kw, cin, cout), jnp.float32) * 0.1
    b = jax.random.normal(k2, (cout,), jnp.float32) * 0.1
    gamma = 1.0 + 0.1 * jax.random.normal(k3, (cout,), jnp.float32)
    beta = 0.1 * jax.random.normal(k4, (cout,), jnp.float32)
    rmean = 0.1 * jax.random.normal(k5, (cout,), jnp.float32)
    rvar = 1.0 + 0.1 * jax.random.uniform(k6, (cout,), jnp.float32)
    s = gamma / jnp.sqrt(rvar + eps)
    w_f = w * s                                   # per-output-channel scale
    b_f = (b - rmean) * s + beta
    return w_f, b_f.reshape(1, cout)


def attention_reference(x_nchw, params):
    """Pure-JAX reference (lax.conv, f32) for validation."""
    wq, bq, wk, bk, wv, bv, wp, bp = params
    x = jnp.transpose(x_nchw, (0, 2, 3, 1))
    dn = ("NHWC", "HWIO", "NHWC")

    def conv(x, w_hwio, b, pad):
        y = jax.lax.conv_general_dilated(
            x, w_hwio, (1, 1), [(pad, pad), (pad, pad)], dimension_numbers=dn)
        return y + b.reshape(1, 1, 1, -1)

    q = jax.nn.relu(conv(x, wq.reshape(1, 1, *wq.shape), bq, 0))
    k = jax.nn.relu(conv(x, wk.reshape(1, 1, *wk.shape), bk, 0))
    v = jax.nn.relu(conv(x, wv, bv, 1))
    psi = jax.nn.sigmoid(
        jax.nn.relu(conv(jax.nn.relu(q * k), wp.reshape(1, 1, *wp.shape), bp, 0)))
    out = psi * v
    return jnp.transpose(out, (0, 3, 1, 2))


if __name__ == "__main__":
    in_channels, out_channels = 4, 32
    sub_channels = out_channels // 4
    N, H, W = 2, 16, 16

    root = jax.random.PRNGKey(0)
    kx, kq, kk, kv, kp = jax.random.split(root, 5)

    x = jax.random.normal(kx, (N, in_channels, H, W), jnp.float32)

    wq, bq = make_folded_conv(kq, 1, 1, in_channels, sub_channels)
    wk, bk = make_folded_conv(kk, 1, 1, in_channels, sub_channels)
    wv, bv = make_folded_conv(kv, 3, 3, in_channels, out_channels)
    wp, bp = make_folded_conv(kp, 1, 1, sub_channels, 1)

    params = (wq.reshape(in_channels, sub_channels), bq,
              wk.reshape(in_channels, sub_channels), bk,
              wv, bv,
              wp.reshape(sub_channels, 1), bp)

    attention_jit = jax.jit(attention_pallas)
    out = jax.block_until_ready(attention_jit(x, params))

    ref = jax.block_until_ready(attention_reference(x, params))
    assert out.shape == (N, out_channels, H, W), out.shape
    assert jnp.allclose(out, ref, rtol=2e-2, atol=2e-2), \
        float(jnp.max(jnp.abs(out - ref)))

    print("KERNEL_OK")
</pallas_src>

<mosaic_0001>
module attributes {stable_mosaic.version = 11 : i64} {
  func.func @attention_kernel(%arg0: memref<37x512xbf16, #tpu.memory_space<vmem>>, %arg1: memref<48x37xbf16, #tpu.memory_space<vmem>>, %arg2: memref<8x1xf32, #tpu.memory_space<vmem>>, %arg3: memref<1x1xf32, #tpu.memory_space<smem>>, %arg4: memref<32x512xf32, #tpu.memory_space<vmem>>) attributes {dimension_semantics = [], scalar_prefetch = 0 : i64, scratch_operands = 0 : i64, tpu.core_type = #tpu.core_type<tc>} {
    %c0 = arith.constant 0 : index
    %c0_0 = arith.constant 0 : index
    %0 = vector.load %arg1[%c0, %c0_0] : memref<48x37xbf16, #tpu.memory_space<vmem>>, vector<48x37xbf16>
    %c0_1 = arith.constant 0 : index
    %c0_2 = arith.constant 0 : index
    %1 = vector.load %arg0[%c0_1, %c0_2] : memref<37x512xbf16, #tpu.memory_space<vmem>>, vector<37x512xbf16>
    %cst = arith.constant dense<0.000000e+00> : vector<48x512xf32>
    %2 = tpu.matmul %0, %1, %cst {dimension_numbers = #tpu.dot_dimension_numbers<[1], [0], [0], [1], [0, 0, 1, 1], [], []>} : vector<48x37xbf16>, vector<37x512xbf16>, vector<48x512xf32> -> vector<48x512xf32>
    %cst_3 = arith.constant 0.000000e+00 : f32
    %3 = vector.broadcast %cst_3 : f32 to vector<48x512xf32>
    %4 = arith.maximumf %2, %3 : vector<48x512xf32>
    %5 = vector.extract_strided_slice %4 {offsets = [0, 0], sizes = [32, 512], strides = [1, 1]} : vector<48x512xf32> to vector<32x512xf32>
    %6 = vector.extract_strided_slice %4 {offsets = [32, 0], sizes = [8, 512], strides = [1, 1]} : vector<48x512xf32> to vector<8x512xf32>
    %7 = vector.extract_strided_slice %4 {offsets = [40, 0], sizes = [8, 512], strides = [1, 1]} : vector<48x512xf32> to vector<8x512xf32>
    %8 = arith.mulf %6, %7 : vector<8x512xf32>
    %c0_4 = arith.constant 0 : index
    %c0_5 = arith.constant 0 : index
    %9 = vector.load %arg2[%c0_4, %c0_5] : memref<8x1xf32, #tpu.memory_space<vmem>>, vector<8x1xf32>
    %10 = vector.broadcast %9 : vector<8x1xf32> to vector<8x512xf32>
    %11 = arith.mulf %8, %10 : vector<8x512xf32>
    %cst_6 = arith.constant dense<0.000000e+00> : vector<512xf32>
    %12 = vector.multi_reduction <add>, %11, %cst_6 [0] : vector<8x512xf32> to vector<512xf32>
    %13 = vector.shape_cast %12 : vector<512xf32> to vector<1x512xf32>
    %c0_7 = arith.constant 0 : index
    %c0_8 = arith.constant 0 : index
    %14 = memref.load %arg3[%c0_7, %c0_8] : memref<1x1xf32, #tpu.memory_space<smem>>
    %15 = vector.broadcast %14 : f32 to vector<1x512xf32>
    %16 = arith.addf %13, %15 : vector<1x512xf32>
    %cst_9 = arith.constant 0.000000e+00 : f32
    %17 = vector.broadcast %cst_9 : f32 to vector<1x512xf32>
    %18 = arith.maximumf %16, %17 : vector<1x512xf32>
    %19 = arith.negf %18 : vector<1x512xf32>
    %20 = math.exp %19 : vector<1x512xf32>
    %cst_10 = arith.constant 1.000000e+00 : f32
    %21 = vector.broadcast %cst_10 : f32 to vector<1x512xf32>
    %22 = arith.addf %21, %20 : vector<1x512xf32>
    %23 = arith.divf %21, %22 : vector<1x512xf32>
    %24 = vector.broadcast %23 : vector<1x512xf32> to vector<32x512xf32>
    %25 = arith.mulf %24, %5 : vector<32x512xf32>
    %c0_11 = arith.constant 0 : index
    %c0_12 = arith.constant 0 : index
    %26 = vector.load %arg4[%c0_11, %c0_12] : memref<32x512xf32, #tpu.memory_space<vmem>>, vector<32x512xf32>
    tpu.vector_store %arg4[%c0_11, %c0_12], %25 {strides = array<i32>} : memref<32x512xf32, #tpu.memory_space<vmem>>, vector<32x512xf32>,
    return
  }
}

</mosaic_0001>

<bundles_post_ra>
// kernel: attention_pallas.1
= control target key start
LH: loop header
LB: loop body
LE: loop exit
PB: predicated region body
PF: predicated region fallthrough
CT: control target
= control target key end

     0   :  { %vm110_vm0 = vcmask 1041408   ;;  %v447_v1 = vmov 0   ;;  %vm111_vm1 = vcmask 1042432   ;;  %v448_v3 = vmov 65535   ;;  %s615_s0 = inlined_call_operand.vmem [shape: bf16[37,512], index: 0, kind: input, shape index: {}]   ;;  %s616_s1 = inlined_call_operand.vmem [shape: bf16[48,37], index: 1, kind: input, shape index: {}]   ;;  %s617_s2 = inlined_call_operand.vmem [shape: f32[8,1], index: 2, kind: input, shape index: {}]   ;;  %s618_s3 = inlined_call_operand.<no memory space> [shape: f32[1,1], index: 3, kind: input, shape index: {}]   ;;  %s619_s4 = inlined_call_operand.vmem [shape: f32[32,512], index: 4, kind: output, shape index: {}]  }
   0x1   :  { %v412_v0 = vld [vmem:[%s615_s0 + $0x4] ss:$16 sps:$4 sm:$0xff]   ;;  %158 = vmatprep.mubr.bf16.mxu0 %v447_v1  ;;  %221 = vmatprep.mubr.bf16.mxu1 %v447_v1  ;;  %v414_v2 = vld [vmem:[%s615_s0 + $0xc] ss:$16 sps:$4 sm:$0xff]   ;;  %v112_v4 = vsel %vm110_vm0, 4294967295, %v448_v3  ;;  %vm100_vm2 = vcmask 302080  }
   0x2   :  { %411 = vset.pattern.permute.xlu0 %v447_v1  ;;  %126 = vmatprep.subr.bf16.mxu0 %v412_v0  ;;  %v416_v5 = vld [vmem:[%s615_s0] ss:$16 sps:$4 sm:$0xff]   ;;  %v417_v6 = vld [vmem:[%s615_s0 + $0x8] ss:$16 sps:$4 sm:$0xff]   ;;  %v418_v7 = vld [vmem:[%s615_s0 + $0x24] ss:$16 sps:$4 sm:$0xff]  }
   0x3   :  { %189 = vmatprep.subr.bf16.mxu1 %v414_v2  ;;  %127 = vmatpush1.bf16.msra.mxu0 %v416_v5  ;;  %v420_v8 = vld [vmem:[%s615_s0 + $0x2c] ss:$16 sps:$4 sm:$0xff]   ;;  %v422_v9 = vld [vmem:[%s615_s0 + $0x20] ss:$16 sps:$4 sm:$0xff]   ;;  %v113_v10 = vsel %vm111_vm1, %v112_v4, 0 }
   0x4   :  { %190 = vmatpush1.bf16.msra.mxu1 %v417_v6  ;;  %128 = vmatprep.subr.bf16.mxu0 %v418_v7  ;;  %v423_v11 = vld [vmem:[%s615_s0 + $0x28] ss:$16 sps:$4 sm:$0xff]   ;;  %v33_v12 = vld [vmem:[%s615_s0 + $0x40] sm:$0x77]  ;;  %v430_v25 = vld [vmem:[%s616_s1 + $0x10] sm:$0xff]  }
   0x5   :  { %v34_v13 = vld [vmem:[%s615_s0 + $0x48] sm:$0x77]  ;;  %191 = vmatprep.subr.bf16.mxu1 %v420_v8  ;;  %v396_v14 = vcombine.high %v33_v12, %v33_v12  ;;  %v395_v16 = vcombine.low %v33_v12, %v33_v12  ;;  %v280_v22 = vld [vmem:[%s617_s2] sm:$0xff] }
   0x6   :  { %v398_v15 = vcombine.high %v34_v13, %v34_v13  ;;  %v397_v17 = vcombine.low %v34_v13, %v34_v13  ;;  %v428_v23 = vld [vmem:[%s616_s1] sm:$0xff]   ;;  %283 = vperm.xlu0 %411, %v280_v22   ;;  %v429_v24 = vld [vmem:[%s616_s1 + $0x8] sm:$0xff]  }
   0x7   :  { %129 = vmatpush1.bf16.msra.mxu0 %v422_v9  ;;  %v118_v18 = vand.u32 %v396_v14, %v113_v10  ;;  %v115_v20 = vand.u32 %v395_v16, %v113_v10 }
   0x8   :  { %192 = vmatpush1.bf16.msra.mxu1 %v423_v11  ;;  %v124_v19 = vand.u32 %v398_v15, %v113_v10  ;;  %v121_v21 = vand.u32 %v397_v17, %v113_v10 }
   0x9   :  { %130 = vmatprep.subr.bf16.mxu0 %v118_v18 }
   0xa   :  { %193 = vmatprep.subr.bf16.mxu1 %v124_v19 }
   0xb   :  { %131 = vmatpush1.bf16.msra.mxu0 %v115_v20 }
   0xc   :  { %194 = vmatpush1.bf16.msra.mxu1 %v121_v21  ;;  %v315_v21 = vstv %s618_s3 }
   0xe   :  { %399 = vmatmul.mubr.msk.bf16.vlgmr.msra.gmra.mrb[0].mxu0 %vm100_vm2, %v428_v23 }
   0xf   :  { %402 = vmatmul.mubr.msk.bf16.vlgmr.msra.gmra.mrb[0].mxu1 %vm100_vm2, %v428_v23  ;;  %168 = vmatprep.mubr.bf16.mxu0 %v447_v1 }
  0x10   :  { %231 = vmatprep.mubr.bf16.mxu1 %v447_v1 }
  0x16   :  { %400 = vmatmul.mubr.msk.bf16.gmra.mrb[4].mxu0 %vm100_vm2, %v429_v24 }
  0x17   :  { %403 = vmatmul.mubr.msk.bf16.gmra.mrb[4].mxu1 %vm100_vm2, %v429_v24  ;;  %178 = vmatprep.mubr.bf16.mxu0 %v447_v1 }
  0x18   :  { %241 = vmatprep.mubr.bf16.mxu1 %v447_v1 }
  0x1e   :  { %401 = vmatmul.mubr.msk.bf16.gmra.mrb[8].mxu0 %vm100_vm2, %v430_v25 }
  0x1f   :  { %404 = vmatmul.mubr.msk.bf16.gmra.mrb[8].mxu1 %vm100_vm2, %v430_v25 }
  0x85   :  { %v284_v58 = vpop.permute.xlu0 %283 }
  0xe1   :  { %v516_v26 = vpop.f32.mrb[0].mxu0 }
  0xe2   :  { %v518_v27 = vpop.f32.mrb[0].mxu1  ;;  %v520_v28 = vpop.f32.mrb[1].mxu0 }
  0xe3   :  { %v522_v29 = vpop.f32.mrb[1].mxu1  ;;  %v524_v30 = vpop.f32.mrb[2].mxu0 }
  0xe4   :  { %v526_v31 = vpop.f32.mrb[2].mxu1  ;;  %v528_v32 = vpop.f32.mrb[3].mxu0 }
  0xe5   :  { %v530_v33 = vpop.f32.mrb[3].mxu1 }
  0xe9   :  { %v532_v34 = vpop.f32.mrb[4].mxu0 }
  0xea   :  { %v534_v35 = vpop.f32.mrb[4].mxu1  ;;  %v536_v36 = vpop.f32.mrb[5].mxu0 }
  0xeb   :  { %v538_v37 = vpop.f32.mrb[5].mxu1  ;;  %v540_v38 = vpop.f32.mrb[6].mxu0 }
  0xec   :  { %v542_v39 = vpop.f32.mrb[6].mxu1  ;;  %v544_v40 = vpop.f32.mrb[7].mxu0 }
  0xed   :  { %v546_v41 = vpop.f32.mrb[7].mxu1 }
  0xf1   :  { %v180_v42 = vpop.f32.mrb[8].mxu0 }
  0xf2   :  { %v243_v43 = vpop.f32.mrb[8].mxu1  ;;  %v182_v44 = vpop.f32.mrb[9].mxu0  ;;  %v268_v48 = vmax.f32 %v180_v42, 0.0 }
  0xf3   :  { %v245_v45 = vpop.f32.mrb[9].mxu1  ;;  %v184_v46 = vpop.f32.mrb[10].mxu0  ;;  %v270_v49 = vmax.f32 %v243_v43, 0.0  ;;  %v269_v54 = vmax.f32 %v182_v44, 0.0 }
  0xf4   :  { %v247_v47 = vpop.f32.mrb[10].mxu1  ;;  %v272_v50 = vmax.f32 %v184_v46, 0.0  ;;  %v186_v52 = vpop.f32.mrb[11].mxu0  ;;  %v271_v55 = vmax.f32 %v245_v45, 0.0 }
  0xf5   :  { %v274_v51 = vmax.f32 %v247_v47, 0.0  ;;  %v249_v53 = vpop.f32.mrb[11].mxu1  ;;  %v273_v56 = vmax.f32 %v186_v52, 0.0 }
  0xf6   :  { %v275_v57 = vmax.f32 %v249_v53, 0.0  ;;  %v276_v59 = vmul.f32 %v272_v50, %v268_v48 }
  0xf7   :  { %v278_v60 = vmul.f32 %v274_v51, %v270_v49  ;;  %v277_v61 = vmul.f32 %v273_v56, %v269_v54 }
  0xf8   :  { %v279_v62 = vmul.f32 %v275_v57, %v271_v55  ;;  %v286_v63 = vmul.f32 %v284_v58, %v276_v59 }
  0xf9   :  { %v288_v0 = vmul.f32 %v284_v58, %v278_v60  ;;  %v287_v1 = vmul.f32 %v284_v58, %v277_v61 }
  0xfa   :  { %v289_v2 = vmul.f32 %v284_v58, %v279_v62  ;;  %v290_v3 = vrot.slane %v286_v63, 4 }
  0xfb   :  { %v302_v4 = vrot.slane %v288_v0, 4  ;;  %v296_v5 = vrot.slane %v287_v1, 4 }
  0xfc   :  { %v308_v6 = vrot.slane %v289_v2, 4  ;;  %v291_v7 = vadd.f32 %v290_v3, %v286_v63  ;;  %v255_v3 = vmax.f32 %v522_v29, 0.0  ;;  %v266_v29 = vmax.f32 %v542_v39, 0.0 }
  0xfd   :  { %v303_v8 = vadd.f32 %v302_v4, %v288_v0  ;;  %v297_v9 = vadd.f32 %v296_v5, %v287_v1  ;;  %v252_v0 = vmax.f32 %v516_v26, 0.0  ;;  %v254_v1 = vmax.f32 %v518_v27, 0.0 }
  0xfe   :  { %v309_v10 = vadd.f32 %v308_v6, %v289_v2  ;;  %v292_v11 = vrot.slane %v291_v7, 2  ;;  %v253_v2 = vmax.f32 %v520_v28, 0.0  ;;  %v256_v4 = vmax.f32 %v524_v30, 0.0 }
  0xff   :  { %v304_v12 = vrot.slane %v303_v8, 2  ;;  %v298_v13 = vrot.slane %v297_v9, 2  ;;  %v258_v5 = vmax.f32 %v526_v31, 0.0  ;;  %v257_v6 = vmax.f32 %v528_v32, 0.0 }
 0x100   :  { %v310_v14 = vrot.slane %v309_v10, 2  ;;  %v293_v15 = vadd.f32 %v292_v11, %v291_v7  ;;  %v259_v7 = vmax.f32 %v530_v33, 0.0  ;;  %v261_v26 = vmax.f32 %v536_v36, 0.0 }
 0x101   :  { %v305_v16 = vadd.f32 %v304_v12, %v303_v8  ;;  %v299_v17 = vadd.f32 %v298_v13, %v297_v9  ;;  %v260_v8 = vmax.f32 %v532_v34, 0.0  ;;  %v262_v9 = vmax.f32 %v534_v35, 0.0 }
 0x102   :  { %v311_v18 = vadd.f32 %v310_v14, %v309_v10  ;;  %v294_v19 = vrot.slane %v293_v15, 1  ;;  %v264_v27 = vmax.f32 %v540_v38, 0.0  ;;  %v263_v28 = vmax.f32 %v538_v37, 0.0 }
 0x103   :  { %v306_v20 = vrot.slane %v305_v16, 1  ;;  %v300_v22 = vrot.slane %v299_v17, 1  ;;  %v265_v30 = vmax.f32 %v544_v40, 0.0  ;;  %v267_v31 = vmax.f32 %v546_v41, 0.0 }
 0x104   :  { %v312_v23 = vrot.slane %v311_v18, 1  ;;  %v295_v24 = vadd.f32 %v294_v19, %v293_v15 }
 0x105   :  { %v307_v25 = vadd.f32 %v306_v20, %v305_v16  ;;  %v301_v42 = vadd.f32 %v300_v22, %v299_v17 }
 0x106   :  { %v313_v43 = vadd.f32 %v312_v23, %v311_v18  ;;  %v316_v44 = vadd.f32 %v315_v21, %v295_v24 }
 0x107   :  { %v318_v45 = vadd.f32 %v315_v21, %v307_v25  ;;  %v317_v46 = vadd.f32 %v315_v21, %v301_v42 }
 0x108   :  { %v319_v47 = vadd.f32 %v315_v21, %v313_v43  ;;  %v320_v48 = vmax.f32 %v316_v44, 0.0 }
 0x109   :  { %v322_v49 = vmax.f32 %v318_v45, 0.0  ;;  %v321_v50 = vmax.f32 %v317_v46, 0.0 }
 0x10a   :  { %v323_v51 = vmax.f32 %v319_v47, 0.0  ;;  %v405_v52 = vmul.f32 -1.442695, %v320_v48 }
 0x10b   :  { %v407_v53 = vmul.f32 -1.442695, %v322_v49  ;;  %v406_v54 = vmul.f32 -1.442695, %v321_v50 }
 0x10c   :  { %v408_v55 = vmul.f32 -1.442695, %v323_v51  ;;  %431 = vpow2.f32 %v405_v52 }
 0x10d   :  { %433 = vpow2.f32 %v406_v54 }
 0x10e   :  { %435 = vpow2.f32 %v407_v53 }
 0x10f   :  { %437 = vpow2.f32 %v408_v55 }
 0x116   :  { %v432_v56 = vpop.eup %431 }
 0x117   :  { %v434_v57 = vpop.eup %433  ;;  %v336_v58 = vadd.f32 1.0, %v432_v56 }
 0x118   :  { %v436_v59 = vpop.eup %435  ;;  %v337_v60 = vadd.f32 1.0, %v434_v57 }
 0x119   :  { %v438_v61 = vpop.eup %437  ;;  %v338_v62 = vadd.f32 1.0, %v436_v59  ;;  %439 = vrcp.f32 %v336_v58 }
 0x11a   :  { %v339_v63 = vadd.f32 1.0, %v438_v61  ;;  %441 = vrcp.f32 %v337_v60 }
 0x11b   :  { %443 = vrcp.f32 %v338_v62 }
 0x11c   :  { %445 = vrcp.f32 %v339_v63 }
 0x123   :  { %v440_v10 = vpop.eup %439 }
 0x124   :  { %v442_v32 = vpop.eup %441  ;;  %v348_v11 = vmul.f32 %v440_v10, %v252_v0  ;;  %v352_v33 = vmul.f32 %v440_v10, %v256_v4  ;;  %v356_v12 = vmul.f32 %v440_v10, %v260_v8  ;;  %v360_v34 = vmul.f32 %v440_v10, %v264_v27 }
 0x125   :  { %v444_v13 = vpop.eup %443  ;;  %v349_v35 = vmul.f32 %v442_v32, %v253_v2  ;;  %v353_v14 = vmul.f32 %v442_v32, %v257_v6  ;;  %v357_v36 = vmul.f32 %v442_v32, %v261_v26  ;;  %v361_v15 = vmul.f32 %v442_v32, %v265_v30 }
 0x126   :  { %v446_v38 = vpop.eup %445  ;;  %v350_v16 = vmul.f32 %v444_v13, %v254_v1  ;;  %v354_v17 = vmul.f32 %v444_v13, %v258_v5  ;;  %v358_v37 = vmul.f32 %v444_v13, %v262_v9  ;;  %v362_v18 = vmul.f32 %v444_v13, %v266_v29  ;;  %364 = vst [vmem:[%s619_s4] sm:$0xff] %v348_v11 }
 0x127   :  { %368 = vst [vmem:[%s619_s4 + $0x20] sm:$0xff] %v352_v33  ;;  %372 = vst [vmem:[%s619_s4 + $0x40] sm:$0xff] %v356_v12  ;;  %v351_v39 = vmul.f32 %v446_v38, %v255_v3  ;;  %v355_v40 = vmul.f32 %v446_v38, %v259_v7  ;;  %v359_v41 = vmul.f32 %v446_v38, %v263_v28 }
 0x128   :  { %376 = vst [vmem:[%s619_s4 + $0x60] sm:$0xff] %v360_v34  ;;  %v363_v19 = vmul.f32 %v446_v38, %v267_v31  ;;  %365 = vst [vmem:[%s619_s4 + $0x8] sm:$0xff] %v349_v35 }
 0x129   :  { %369 = vst [vmem:[%s619_s4 + $0x28] sm:$0xff] %v353_v14  ;;  %373 = vst [vmem:[%s619_s4 + $0x48] sm:$0xff] %v357_v36 }
 0x12a   :  { %377 = vst [vmem:[%s619_s4 + $0x68] sm:$0xff] %v361_v15  ;;  %366 = vst [vmem:[%s619_s4 + $0x10] sm:$0xff] %v350_v16 }
 0x12b   :  { %370 = vst [vmem:[%s619_s4 + $0x30] sm:$0xff] %v354_v17  ;;  %374 = vst [vmem:[%s619_s4 + $0x50] sm:$0xff] %v358_v37 }
 0x12c   :  { %378 = vst [vmem:[%s619_s4 + $0x70] sm:$0xff] %v362_v18  ;;  %367 = vst [vmem:[%s619_s4 + $0x18] sm:$0xff] %v351_v39 }
 0x12d   :  { %371 = vst [vmem:[%s619_s4 + $0x38] sm:$0xff] %v355_v40  ;;  %375 = vst [vmem:[%s619_s4 + $0x58] sm:$0xff] %v359_v41 }
 0x12e   :  { %379 = vst [vmem:[%s619_s4 + $0x78] sm:$0xff] %v363_v19 }

</bundles_post_ra>
